<compile_context>
chip_gen: v7x
topology: tpu7x:2x2x1
jax: 0.10.0
libtpu: 0.0.40
codegen_flags: <defaults>
</compile_context>

<pallas_src>
import functools

import numpy as np
import jax
import jax.numpy as jnp
from jax.experimental import pallas as pl
from jax.experimental.pallas import tpu as pltpu


def _round_up(v, m):
    return ((v + m - 1) // m) * m


# ---------------------------------------------------------------------------
# Shared MLP epilogue: weights = sigmoid(mlp(max) + mlp(avg)), fused as one
# stacked (2, C) Linear1+ReLU pass, summed hidden rows, one Linear2 pass.
# b2 appears in both reference branches, hence the 2*b2 term.
# ---------------------------------------------------------------------------
def _mlp_sigmoid(c_max, c_avg, w1_ref, b1_ref, w2_ref, b2_ref):
    stats = jnp.concatenate([c_max, c_avg], axis=0)                  # (2, C)
    h = jnp.dot(stats, w1_ref[...], preferred_element_type=jnp.float32) + b1_ref[...]
    h = jnp.maximum(h, 0.0)                                          # (2, bneck)
    h_sum = jnp.sum(h, axis=0, keepdims=True)                        # (1, bneck)
    logits = (jnp.dot(h_sum, w2_ref[...], preferred_element_type=jnp.float32)
              + 2.0 * b2_ref[...])                                   # (1, C)
    return jax.nn.sigmoid(logits)                                    # (1, C)


# ---------------------------------------------------------------------------
# Single-pass kernel: one whole image per grid step (grid=(B,)).
# ---------------------------------------------------------------------------
def _fused_kernel(x_ref, w1_ref, b1_ref, w2_ref, b2_ref, o_ref, *, inv_hw):
    # x_ref/o_ref: (1, C, HW).  The block spans the full (unpadded) spatial
    # extent, so the reductions only ever see valid lanes — no masking needed.
    x = x_ref[...]
    c_max = jnp.max(x, axis=-1)                                      # (1, C)
    c_avg = jnp.sum(x, axis=-1) * inv_hw                             # (1, C)
    w = _mlp_sigmoid(c_max, c_avg, w1_ref, b1_ref, w2_ref, b2_ref)
    # Re-index x_ref (instead of reusing `x`) so the full block does not stay
    # live across the reduction + MLP epilogue for large C*HW blocks.
    o_ref[...] = x_ref[...] * w[:, :, None]


# ---------------------------------------------------------------------------
# Two-pass fallback, pass 1: accumulate per-channel max/sum over spatial tiles,
# compute sigmoid(MLP) weights at the last tile.  grid=(B, n_tiles).
# ---------------------------------------------------------------------------
def _reduce_kernel(x_ref, w1_ref, b1_ref, w2_ref, b2_ref, wout_ref, acc_ref, *,
                   hw, tile_hw):
    t = pl.program_id(1)
    c = acc_ref.shape[1]

    @pl.when(t == 0)
    def _():
        acc_ref[0:1, :] = jnp.full((1, c), -jnp.inf, dtype=jnp.float32)
        acc_ref[1:2, :] = jnp.zeros((1, c), dtype=jnp.float32)

    x = x_ref[...]                                                   # (1, C, tile_hw)
    if hw % tile_hw != 0:
        # Last tile extends past H*W; its tail lanes are undefined -> mask them
        # out of the max (-inf) and the sum (0) using the global lane index.
        lane = jax.lax.broadcasted_iota(jnp.int32, x.shape, 2)
        valid = (t * tile_hw + lane) < hw
        x_max = jnp.where(valid, x, -jnp.inf)
        x_sum = jnp.where(valid, x, 0.0)
    else:
        x_max = x
        x_sum = x

    acc_ref[0:1, :] = jnp.maximum(acc_ref[0:1, :], jnp.max(x_max, axis=-1))
    acc_ref[1:2, :] = acc_ref[1:2, :] + jnp.sum(x_sum, axis=-1)

    @pl.when(t == pl.num_programs(1) - 1)
    def _():
        c_max = acc_ref[0:1, :]
        c_avg = acc_ref[1:2, :] * (1.0 / hw)                         # true H*W divisor
        wout_ref[...] = _mlp_sigmoid(c_max, c_avg, w1_ref, b1_ref, w2_ref, b2_ref)


# ---------------------------------------------------------------------------
# Two-pass fallback, pass 2: stream X again and apply the per-channel scale.
# Out-of-bounds tail of the last tile is discarded by Pallas' masked writeback.
# ---------------------------------------------------------------------------
def _scale_kernel(x_ref, w_ref, o_ref):
    o_ref[...] = x_ref[...] * w_ref[...][:, :, None]


# ---------------------------------------------------------------------------
# Resident (grid-invariant) operand specs: single-buffer if the backend
# supports pipeline_mode=pl.Buffered(1); otherwise fall back to the default.
# ---------------------------------------------------------------------------
_SINGLE_BUFFER_OK = None


def _probe_copy_kernel(x_ref, o_ref):
    o_ref[...] = x_ref[...]


def _single_buffer_supported():
    global _SINGLE_BUFFER_OK
    if _SINGLE_BUFFER_OK is None:
        try:
            spec = pl.BlockSpec((8, 128), lambda i: (0, 0),
                                pipeline_mode=pl.Buffered(buffer_count=1))
            fn = pl.pallas_call(
                _probe_copy_kernel,
                out_shape=jax.ShapeDtypeStruct((8, 128), jnp.float32),
                grid=(2,),
                in_specs=[spec],
                out_specs=pl.BlockSpec((8, 128), lambda i: (0, 0)),
            )
            jax.block_until_ready(fn(jnp.zeros((8, 128), jnp.float32)))
            _SINGLE_BUFFER_OK = True
        except Exception:
            _SINGLE_BUFFER_OK = False
    return _SINGLE_BUFFER_OK


def _resident_spec(shape):
    index_map = lambda *args, _n=len(shape): (0,) * _n
    if _single_buffer_supported():
        return pl.BlockSpec(shape, index_map,
                            pipeline_mode=pl.Buffered(buffer_count=1))
    return pl.BlockSpec(shape, index_map)


def _vmem_budget_bytes():
    """~80% of physical VMEM: ~51 MiB on v7x, ~102 MiB on v5e/v6e."""
    try:
        cap = int(pltpu.get_tpu_info().vmem_capacity_bytes)
    except Exception:
        cap = 64 * 1024 * 1024        # conservative (v7x-sized) fallback
    return int(0.8 * cap)


# ---------------------------------------------------------------------------
# Wrapper
# ---------------------------------------------------------------------------
def _single_pass(x, w1, b1, w2, b2, budget):
    B, C, hw = x.shape
    bneck = w1.shape[1]
    kernel = functools.partial(_fused_kernel, inv_hw=1.0 / hw)
    cost = pl.CostEstimate(
        flops=B * (3 * C * hw + 6 * C * bneck),
        transcendentals=B * C,
        bytes_accessed=2 * B * C * hw * 4,
    )
    grid_spec = pltpu.PrefetchScalarGridSpec(
        num_scalar_prefetch=0,
        grid=(B,),
        in_specs=[
            pl.BlockSpec((1, C, hw), lambda b: (b, 0, 0)),   # x: one image / step
            _resident_spec((C, bneck)),                      # w1 (resident)
            _resident_spec((1, bneck)),                      # b1
            _resident_spec((bneck, C)),                      # w2
            _resident_spec((1, C)),                          # b2
        ],
        out_specs=pl.BlockSpec((1, C, hw), lambda b: (b, 0, 0)),
    )
    return pl.pallas_call(
        kernel,
        out_shape=jax.ShapeDtypeStruct((B, C, hw), jnp.float32),
        grid_spec=grid_spec,
        compiler_params=pltpu.CompilerParams(
            dimension_semantics=("parallel",),
            vmem_limit_bytes=budget),
        cost_estimate=cost,
    )(x, w1, b1, w2, b2)


def _two_pass(x, w1, b1, w2, b2, budget, tile_hw):
    B, C, hw = x.shape
    bneck = w1.shape[1]
    n_t = (hw + tile_hw - 1) // tile_hw

    reduce_kernel = functools.partial(_reduce_kernel, hw=hw, tile_hw=tile_hw)
    weights = pl.pallas_call(
        reduce_kernel,
        out_shape=jax.ShapeDtypeStruct((B, C), jnp.float32),
        grid_spec=pltpu.PrefetchScalarGridSpec(
            num_scalar_prefetch=0,
            grid=(B, n_t),
            in_specs=[
                pl.BlockSpec((1, C, tile_hw), lambda b, t: (b, 0, t)),
                _resident_spec((C, bneck)),
                _resident_spec((1, bneck)),
                _resident_spec((bneck, C)),
                _resident_spec((1, C)),
            ],
            out_specs=pl.BlockSpec((1, C), lambda b, t: (b, 0)),
            scratch_shapes=[pltpu.VMEM((2, C), jnp.float32)],   # [max; sum]
        ),
        compiler_params=pltpu.CompilerParams(
            dimension_semantics=("parallel", "arbitrary"),
            vmem_limit_bytes=budget),
        cost_estimate=pl.CostEstimate(
            flops=B * (2 * C * hw + 6 * C * bneck),
            transcendentals=B * C,
            bytes_accessed=B * C * hw * 4),
    )(x, w1, b1, w2, b2)

    out = pl.pallas_call(
        _scale_kernel,
        out_shape=jax.ShapeDtypeStruct((B, C, hw), jnp.float32),
        grid_spec=pltpu.PrefetchScalarGridSpec(
            num_scalar_prefetch=0,
            grid=(B, n_t),
            in_specs=[
                pl.BlockSpec((1, C, tile_hw), lambda b, t: (b, 0, t)),
                pl.BlockSpec((1, C), lambda b, t: (b, 0)),
            ],
            out_specs=pl.BlockSpec((1, C, tile_hw), lambda b, t: (b, 0, t)),
        ),
        compiler_params=pltpu.CompilerParams(
            dimension_semantics=("parallel", "parallel"),
            vmem_limit_bytes=budget),
        cost_estimate=pl.CostEstimate(
            flops=B * C * hw,
            transcendentals=0,
            bytes_accessed=2 * B * C * hw * 4),
    )(x, weights)
    return out


def conv_attention_channel(x_nchw, w1, b1, w2, b2, *, force_two_pass=False, tile_hw=None):
    """x_nchw: (B, C, H, W) float32. Returns (B, C, H, W) float32."""
    B, C, H, W = x_nchw.shape
    hw = H * W
    bneck = w1.shape[1]

    # Free metadata reshape — no HBM copy, no padding, no output slice.
    x = x_nchw.reshape(B, C, hw).astype(jnp.float32)

    budget = _vmem_budget_bytes()
    slack = 2 * 1024 * 1024

    # Rough padded-VMEM footprints (f32) for the fit decision.
    c8, c128 = _round_up(C, 8), _round_up(C, 128)
    bn8, bn128 = _round_up(bneck, 8), _round_up(bneck, 128)
    hw128 = _round_up(hw, 128)
    block_bytes = c8 * hw128 * 4                           # one (1, C, hw) image block
    weight_bufs = 1 if _single_buffer_supported() else 2
    weight_bytes = weight_bufs * 4 * (c8 * bn128 + 8 * bn128 + bn8 * c128 + 8 * c128)

    single_pass_fits = (4 * block_bytes + weight_bytes + slack) <= budget

    if single_pass_fits and not force_two_pass:
        out = _single_pass(x, w1, b1, w2, b2, budget)
    else:
        if tile_hw is None:
            avail = max(budget - weight_bytes - slack, 16 * c8 * 128)
            tile_hw = max(128, (avail // (16 * c8)) // 128 * 128)
        tile_hw = int(min(_round_up(int(tile_hw), 128), hw128))
        out = _two_pass(x, w1, b1, w2, b2, budget, tile_hw)

    return out.reshape(B, C, H, W)


# ---------------------------------------------------------------------------
# Pure-JAX reference + parameter helper
# ---------------------------------------------------------------------------
def _reference(x_nchw, w1, b1, w2, b2):
    c_max = jnp.max(x_nchw, axis=(2, 3))                   # (B, C)
    c_avg = jnp.mean(x_nchw, axis=(2, 3))                  # (B, C)

    def mlp(v):
        h = jnp.maximum(v @ w1 + b1, 0.0)
        return h @ w2 + b2

    weights = jax.nn.sigmoid(mlp(c_max) + mlp(c_avg))
    return x_nchw * weights[:, :, None, None]


def _make_params(key, C, bottleneck_ratio=0.2):
    bneck = int(np.ceil(bottleneck_ratio * C))
    k1, k2, k3, k4 = jax.random.split(key, 4)
    # Linear weights stored transposed vs. PyTorch (PyTorch computes x @ W.T + b).
    w1 = jax.random.normal(k1, (C, bneck), dtype=jnp.float32) / np.sqrt(C)
    b1 = jax.random.normal(k2, (1, bneck), dtype=jnp.float32) * 0.1
    w2 = jax.random.normal(k3, (bneck, C), dtype=jnp.float32) / np.sqrt(max(bneck, 1))
    b2 = jax.random.normal(k4, (1, C), dtype=jnp.float32) * 0.1
    return w1, b1, w2, b2


if __name__ == "__main__":
    key = jax.random.PRNGKey(0)

    # Case 1: 128-aligned spatial extent, single-pass path.
    kx, kp, key = jax.random.split(key, 3)
    x = jax.random.normal(kx, (2, 4, 16, 16), dtype=jnp.float32)
    w1, b1, w2, b2 = _make_params(kp, 4)
    out = jax.block_until_ready(conv_attention_channel(x, w1, b1, w2, b2))
    np.testing.assert_allclose(np.asarray(out),
                               np.asarray(_reference(x, w1, b1, w2, b2)),
                               rtol=1e-5, atol=1e-5)

    # Case 2: non-128-aligned H*W, single-pass path (no host pad / output slice;
    # the ragged lane tail is handled by Pallas masked DMAs).
    kx, kp, key = jax.random.split(key, 3)
    x2 = jax.random.normal(kx, (2, 4, 14, 14), dtype=jnp.float32)
    w1b, b1b, w2b, b2b = _make_params(kp, 4)
    out2 = jax.block_until_ready(conv_attention_channel(x2, w1b, b1b, w2b, b2b))
    np.testing.assert_allclose(np.asarray(out2),
                               np.asarray(_reference(x2, w1b, b1b, w2b, b2b)),
                               rtol=1e-5, atol=1e-5)

    # Case 3: exercise the spatially-tiled two-pass fallback (the path large
    # images take on v7x) with a ragged final tile: H*W = 540, tile = 128.
    kx, kp, key = jax.random.split(key, 3)
    x3 = jax.random.normal(kx, (2, 8, 18, 30), dtype=jnp.float32)
    w1c, b1c, w2c, b2c = _make_params(kp, 8)
    out3 = jax.block_until_ready(
        conv_attention_channel(x3, w1c, b1c, w2c, b2c, force_two_pass=True, tile_hw=128))
    np.testing.assert_allclose(np.asarray(out3),
                               np.asarray(_reference(x3, w1c, b1c, w2c, b2c)),
                               rtol=1e-5, atol=1e-5)

    print("KERNEL_OK")
</pallas_src>

<mosaic_0001>
module attributes {stable_mosaic.version = 11 : i64} {
  func.func @_probe_copy_kernel(%arg0: i32, %arg1: memref<8x128xf32, #tpu.memory_space<vmem>>, %arg2: memref<8x128xf32, #tpu.memory_space<vmem>>) attributes {dimension_semantics = [#tpu.dimension_semantics<arbitrary>], iteration_bounds = array<i64: 2>, scalar_prefetch = 0 : i64, scratch_operands = 0 : i64, tpu.core_type = #tpu.core_type<tc>, window_params = [{pipeline_mode = #tpu.pipeline_mode<synchronous>, transform_indices = @transform_0, window_bounds = array<i64: 8, 128>}, {pipeline_mode = #tpu.pipeline_mode<synchronous>, transform_indices = @transform_1, window_bounds = array<i64: 8, 128>}]} {
    %c0 = arith.constant 0 : index
    %c0_0 = arith.constant 0 : index
    %0 = vector.load %arg1[%c0, %c0_0] : memref<8x128xf32, #tpu.memory_space<vmem>>, vector<8x128xf32>
    %c0_1 = arith.constant 0 : index
    %c0_2 = arith.constant 0 : index
    %1 = vector.load %arg2[%c0_1, %c0_2] : memref<8x128xf32, #tpu.memory_space<vmem>>, vector<8x128xf32>
    tpu.vector_store %arg2[%c0_1, %c0_2], %0 {strides = array<i32>} : memref<8x128xf32, #tpu.memory_space<vmem>>, vector<8x128xf32>,
    return
  }
  func.func @transform_0(%arg0: i32) -> (i32, i32) {
    %c0_i32 = arith.constant 0 : i32
    %c0_i32_0 = arith.constant 0 : i32
    %c0_i32_1 = arith.constant 0 : i32
    return %c0_i32, %c0_i32_0 : i32, i32
  }
  func.func @transform_1(%arg0: i32) -> (i32, i32) {
    %c0_i32 = arith.constant 0 : i32
    %c0_i32_0 = arith.constant 0 : i32
    %c0_i32_1 = arith.constant 0 : i32
    return %c0_i32, %c0_i32_0 : i32, i32
  }
}

module attributes {stable_mosaic.version = 11 : i64} {
  func.func @_fused_kernel(%arg0: i32, %arg1: memref<1x4x256xf32, #tpu.memory_space<vmem>>, %arg2: memref<4x1xf32, #tpu.memory_space<vmem>>, %arg3: memref<1x1xf32, #tpu.memory_space<vmem>>, %arg4: memref<1x4xf32, #tpu.memory_space<vmem>>, %arg5: memref<1x4xf32, #tpu.memory_space<vmem>>, %arg6: memref<1x4x256xf32, #tpu.memory_space<vmem>>) attributes {dimension_semantics = [#tpu.dimension_semantics<parallel>], iteration_bounds = array<i64: 2>, scalar_prefetch = 0 : i64, scratch_operands = 0 : i64, tpu.core_type = #tpu.core_type<tc>, window_params = [{transform_indices = @transform_0, window_bounds = array<i64: 1, 4, 256>}, {pipeline_mode = #tpu.pipeline_mode<synchronous>, transform_indices = @transform_1, window_bounds = array<i64: 4, 1>}, {pipeline_mode = #tpu.pipeline_mode<synchronous>, transform_indices = @transform_2, window_bounds = array<i64: 1, 1>}, {pipeline_mode = #tpu.pipeline_mode<synchronous>, transform_indices = @transform_3, window_bounds = array<i64: 1, 4>}, {pipeline_mode = #tpu.pipeline_mode<synchronous>, transform_indices = @transform_4, window_bounds = array<i64: 1, 4>}, {transform_indices = @transform_5, window_bounds = array<i64: 1, 4, 256>}]} {
    %c0 = arith.constant 0 : index
    %c0_0 = arith.constant 0 : index
    %c0_1 = arith.constant 0 : index
    %0 = vector.load %arg1[%c0, %c0_0, %c0_1] : memref<1x4x256xf32, #tpu.memory_space<vmem>>, vector<1x4x256xf32>
    %cst = arith.constant dense<0xFF800000> : vector<1x4xf32>
    %1 = vector.multi_reduction <maximumf>, %0, %cst [2] : vector<1x4x256xf32> to vector<1x4xf32>
    %cst_2 = arith.constant dense<0.000000e+00> : vector<1x4xf32>
    %2 = vector.multi_reduction <add>, %0, %cst_2 [2] : vector<1x4x256xf32> to vector<1x4xf32>
    %cst_3 = arith.constant 3.906250e-03 : f32
    %3 = vector.broadcast %cst_3 : f32 to vector<1x4xf32>
    %4 = arith.mulf %2, %3 : vector<1x4xf32>
    %5 = tpu.concatenate %1, %4 in 0 : vector<1x4xf32>, vector<1x4xf32> -> vector<2x4xf32>
    %c0_4 = arith.constant 0 : index
    %c0_5 = arith.constant 0 : index
    %6 = vector.load %arg2[%c0_4, %c0_5] : memref<4x1xf32, #tpu.memory_space<vmem>>, vector<4x1xf32>
    %cst_6 = arith.constant dense<0.000000e+00> : vector<2x1xf32>
    %7 = tpu.matmul %5, %6, %cst_6 {dimension_numbers = #tpu.dot_dimension_numbers<[1], [0], [0], [1], [0, 0, 1, 1], [], []>} : vector<2x4xf32>, vector<4x1xf32>, vector<2x1xf32> -> vector<2x1xf32>
    %c0_7 = arith.constant 0 : index
    %c0_8 = arith.constant 0 : index
    %8 = vector.load %arg3[%c0_7, %c0_8] : memref<1x1xf32, #tpu.memory_space<vmem>>, vector<1x1xf32>
    %9 = vector.broadcast %8 : vector<1x1xf32> to vector<2x1xf32>
    %10 = arith.addf %7, %9 : vector<2x1xf32>
    %cst_9 = arith.constant 0.000000e+00 : f32
    %11 = vector.broadcast %cst_9 : f32 to vector<2x1xf32>
    %12 = arith.maximumf %10, %11 : vector<2x1xf32>
    %cst_10 = arith.constant dense<0.000000e+00> : vector<1xf32>
    %13 = vector.multi_reduction <add>, %12, %cst_10 [0] : vector<2x1xf32> to vector<1xf32>
    %14 = vector.shape_cast %13 : vector<1xf32> to vector<1x1xf32>
    %c0_11 = arith.constant 0 : index
    %c0_12 = arith.constant 0 : index
    %15 = vector.load %arg4[%c0_11, %c0_12] : memref<1x4xf32, #tpu.memory_space<vmem>>, vector<1x4xf32>
    %cst_13 = arith.constant dense<0.000000e+00> : vector<1x4xf32>
    %16 = tpu.matmul %14, %15, %cst_13 {dimension_numbers = #tpu.dot_dimension_numbers<[1], [0], [0], [1], [0, 0, 1, 1], [], []>} : vector<1x1xf32>, vector<1x4xf32>, vector<1x4xf32> -> vector<1x4xf32>
    %c0_14 = arith.constant 0 : index
    %c0_15 = arith.constant 0 : index
    %17 = vector.load %arg5[%c0_14, %c0_15] : memref<1x4xf32, #tpu.memory_space<vmem>>, vector<1x4xf32>
    %cst_16 = arith.constant 2.000000e+00 : f32
    %18 = vector.broadcast %cst_16 : f32 to vector<1x4xf32>
    %19 = arith.mulf %18, %17 : vector<1x4xf32>
    %20 = arith.addf %16, %19 : vector<1x4xf32>
    %21 = arith.negf %20 : vector<1x4xf32>
    %22 = math.exp %21 : vector<1x4xf32>
    %cst_17 = arith.constant 1.000000e+00 : f32
    %23 = vector.broadcast %cst_17 : f32 to vector<1x4xf32>
    %24 = arith.addf %23, %22 : vector<1x4xf32>
    %25 = arith.divf %23, %24 : vector<1x4xf32>
    %c0_18 = arith.constant 0 : index
    %c0_19 = arith.constant 0 : index
    %c0_20 = arith.constant 0 : index
    %26 = vector.load %arg1[%c0_18, %c0_19, %c0_20] : memref<1x4x256xf32, #tpu.memory_space<vmem>>, vector<1x4x256xf32>
    %27 = vector.shape_cast %25 : vector<1x4xf32> to vector<1x4x1xf32>
    %28 = vector.broadcast %27 : vector<1x4x1xf32> to vector<1x4x256xf32>
    %29 = arith.mulf %26, %28 : vector<1x4x256xf32>
    %c0_21 = arith.constant 0 : index
    %c0_22 = arith.constant 0 : index
    %c0_23 = arith.constant 0 : index
    %30 = vector.load %arg6[%c0_21, %c0_22, %c0_23] : memref<1x4x256xf32, #tpu.memory_space<vmem>>, vector<1x4x256xf32>
    tpu.vector_store %arg6[%c0_21, %c0_22, %c0_23], %29 {strides = array<i32>} : memref<1x4x256xf32, #tpu.memory_space<vmem>>, vector<1x4x256xf32>,
    return
  }
  func.func @transform_0(%arg0: i32) -> (i32, i32, i32) {
    %c0_i32 = arith.constant 0 : i32
    %c0_i32_0 = arith.constant 0 : i32
    %c0_i32_1 = arith.constant 0 : i32
    return %arg0, %c0_i32, %c0_i32_0 : i32, i32, i32
  }
  func.func @transform_1(%arg0: i32) -> (i32, i32) {
    %c0_i32 = arith.constant 0 : i32
    %c0_i32_0 = arith.constant 0 : i32
    %c0_i32_1 = arith.constant 0 : i32
    return %c0_i32, %c0_i32_0 : i32, i32
  }
  func.func @transform_2(%arg0: i32) -> (i32, i32) {
    %c0_i32 = arith.constant 0 : i32
    %c0_i32_0 = arith.constant 0 : i32
    %c0_i32_1 = arith.constant 0 : i32
    return %c0_i32, %c0_i32_0 : i32, i32
  }
  func.func @transform_3(%arg0: i32) -> (i32, i32) {
    %c0_i32 = arith.constant 0 : i32
    %c0_i32_0 = arith.constant 0 : i32
    %c0_i32_1 = arith.constant 0 : i32
    return %c0_i32, %c0_i32_0 : i32, i32
  }
  func.func @transform_4(%arg0: i32) -> (i32, i32) {
    %c0_i32 = arith.constant 0 : i32
    %c0_i32_0 = arith.constant 0 : i32
    %c0_i32_1 = arith.constant 0 : i32
    return %c0_i32, %c0_i32_0 : i32, i32
  }
  func.func @transform_5(%arg0: i32) -> (i32, i32, i32) {
    %c0_i32 = arith.constant 0 : i32
    %c0_i32_0 = arith.constant 0 : i32
    %c0_i32_1 = arith.constant 0 : i32
    return %arg0, %c0_i32, %c0_i32_0 : i32, i32, i32
  }
}

</mosaic_0001>

<bundles_post_ra>
// kernel: tpu_custom_call.1
= control target key start
LH: loop header
LB: loop body
LE: loop exit
PB: predicated region body
PF: predicated region fallthrough
CT: control target
= control target key end

     0   :  { %6 = vsyncpa [#allocation3], 0  ;;  %s340_s0 = inlined_call_operand.hbm [shape: f32[8,128], index: 0, kind: input, shape index: {}]   ;;  %s341_s1 = inlined_call_operand.hbm [shape: f32[8,128], index: 1, kind: output, shape index: {}]  }
   0x1   :  { %7 = vsyncpa [#allocation4], 0  ;;  %s261_s6 = smov 0  }
   0x2 LB: > { %s144_s7 = sadd.s32 4294967295, %s247_s6   ;;  %p145_p0 = scmp.ge.s32.totalorder %s247_s6, 1  ;;  %s247_s6 = sphi %s261_s6, %s13_s6  }
   0x3   : > { %p60_p1 = scmp.lt.s32.totalorder %s247_s6, 3  ;;  %p275_p3 = scmp.eq.s32.totalorder %s144_s7, 0 }
   0x4   : > { %s249_s10 = smov [#allocation2]   ;;  %s179_s15 = scalar_lea.hbm %s340_s0, 128 }
   0x5   : > { %p269_p2 = pnand %p145_p0, %p60_p1  ;;  %s73_s11 = sshll.u32 %s249_s10, 4  ;;  %s74_s11 = int_to_ptr.vmem [resolvable:$true] %s73_s11 }
   0x6   : > { %s346_s9 = scalar_select %p275_p3, 1, 0 }
   0x7   : > { %s345_s8 = scalar_select %p269_p2, 1, 0 }
   0x8   : > { %p161_p4 = pneg %p269_p2  ;;  %p180_p6 = scmp.ne.s32.totalorder %s340_s0, %s179_s15 }
   0x9   : > { %p186_p10 = scmp.lt.u32.totalorder %s179_s15, %s340_s0 }
   0xa   : > { %p283_p5 = pnand %p275_p3, %p161_p4 }
   0xc   : > { %p181_p7 = pneg %p283_p5 }
   0xe   : > { %p182_p8 = pnand %p181_p7, %p180_p6 }
  0x10   : > { %p183_p9 = pneg %p182_p8 }
  0x12   : > { %p188_p11 = pnand %p186_p10, %p183_p9 }
  0x14   : > { %191 = shalt.err (!%p188_p11)
}
  0x15   : > { %s192_s20 = scalar_lea.vmem %s74_s11, 128  ;;  %p200_p1 = scmp.lt.s32.totalorder %s74_s11, %s74_s11 }
  0x16   : > { %p193_p12 = scmp.ne.s32.totalorder %s74_s11, %s192_s20  ;;  %p201_p4 = scmp.lt.s32.totalorder %s192_s20, %s192_s20 }
  0x18   : > { %p195_p13 = pnand %p193_p12, %p181_p7  ;;  %p202_p3 = por %p201_p4, %p200_p1 }
  0x1a   : > { %p196_p0 = pneg %p195_p13 }
  0x1c   : > { %p203_p2 = pnand %p202_p3, %p196_p0 }
  0x1e   : > { %206 = shalt.err (!%p203_p2)
}
  0x1f   : > { %164 = dma.hbm_to_vmem [thread:$0]  (!%p283_p5), %s340_s0, 128, %s74_s11, [#allocation3]  }
  0x20   : > { %p348_p6 = scmp.ne.s32.totalorder %s345_s8, 0 }
  0x21   : > { %p349_p8 = scmp.ne.s32.totalorder (!%p348_p6), %s346_s9, 0 }
  0x22   : > { %86 = sbr.rel (%p348_p6) target bundleno = 67 (0x43), region = 24 }
  0x29   : > { %238 = dma.done.wait (%p349_p8), [#allocation3], 128  }
  0x2a   : > { %240 = vsyncadd (%p349_p8), [#allocation3], 4294967168  ;;  %s250_s23 = smov [#allocation5]   ;;  %p311_p2 = scmp.eq.s32.totalorder %s144_s7, 1  ;;  %v96_v0 = vld [vmem:[#allocation2] sm:$0xff] }
  0x2b   : > { %s105_s24 = sshll.u32 %s250_s23, 4  ;;  %97 = vst [vmem:[#allocation5] sm:$0xff] %v96_v0  ;;  %s106_s24 = int_to_ptr.vmem [resolvable:$true] %s105_s24 }
  0x2c   : > { %s207_s26 = scalar_lea.vmem %s106_s24, 128  ;;  %p214_p9 = scmp.lt.s32.totalorder %s106_s24, %s106_s24 }
  0x2d   : > { %p208_p3 = scmp.ne.s32.totalorder %s106_s24, %s207_s26  ;;  %p215_p10 = scmp.lt.s32.totalorder %s207_s26, %s207_s26 }
  0x2f   : > { %p209_p5 = pnand %p208_p3, %p311_p2  ;;  %p216_p11 = por %p215_p10, %p214_p9 }
  0x31   : > { %p210_p7 = pneg %p209_p5 }
  0x33   : > { %p217_p12 = pnand %p216_p11, %p210_p7 }
  0x35   : > { %220 = shalt.err (!%p217_p12)
}
  0x36   : > { %s221_s29 = scalar_lea.hbm %s341_s1, 128 }
  0x37   : > { %p222_p13 = scmp.ne.s32.totalorder %s341_s1, %s221_s29  ;;  %p227_p4 = scmp.lt.u32.totalorder %s221_s29, %s341_s1 }
  0x39   : > { %p223_p0 = pnand %p222_p13, %p311_p2 }
  0x3b   : > { %p224_p1 = pneg %p223_p0 }
  0x3d   : > { %p229_p6 = pnand %p227_p4, %p224_p1 }
  0x3f   : > { %232 = shalt.err (!%p229_p6)
}
  0x40   : > { %158 = dma.vmem_to_hbm [thread:$0]  (%p311_p2), %s106_s24, 128, %s341_s1, [#allocation4]  }
  0x41   : > { %242 = dma.done.wait (%p311_p2), [#allocation4], 128  }
  0x42   : > { %244 = vsyncadd (%p311_p2), [#allocation4], 4294967168 }
  0x43 PF: > { %s13_s6 = sadd.s32 1, %s247_s6  }
  0x44   : > { %p10_p8 = scmp.ge.s32.totalorder %s13_s6, 4  }
  0x46   :  { %12 = sbr.rel (!%p10_p8) target bundleno = 2 (0x2), region = 53 }
  0x4d   :  { %118 = vsyncpa [#allocation3], 1 }
  0x4e   :  { %120 = vsyncpa [#allocation3 + $0x1], 1 }
  0x4f   :  { %121 = vsyncpa [#allocation4], 1 }
  0x50   :  { %123 = vsyncpa [#allocation4 + $0x1], 1 }

// kernel: tpu_custom_call.1
= control target key start
LH: loop header
LB: loop body
LE: loop exit
PB: predicated region body
PF: predicated region fallthrough
CT: control target
= control target key end

     0   :  { %s970_s0 = inlined_call_operand.hbm [shape: f32[2,4,256], index: 0, kind: input, shape index: {}]   ;;  %s971_s1 = inlined_call_operand.vmem [shape: f32[4,1], index: 1, kind: input, shape index: {}]   ;;  %s972_s2 = inlined_call_operand.<no memory space> [shape: f32[1,1], index: 2, kind: input, shape index: {}]   ;;  %s973_s3 = inlined_call_operand.vmem [shape: f32[1,4], index: 3, kind: input, shape index: {}]   ;;  %s974_s4 = inlined_call_operand.vmem [shape: f32[1,4], index: 4, kind: input, shape index: {}]   ;;  %s975_s5 = inlined_call_operand.hbm [shape: f32[2,4,256], index: 5, kind: output, shape index: {}]  }
   0x1   :  { %v10_v0 = vstv %s972_s2 }
   0x2   :  { %11 = vst [vmem:[#allocation2] sm:$0x1] %v10_v0 }
   0x3   :  { %12 = vsyncpa [#allocation4], 0 }
   0x4   :  { %14 = vsyncpa [#allocation4 + $0x1], 0 }
   0x5   :  { %15 = vsyncpa [#allocation5], 0 }
   0x6   :  { %17 = vsyncpa [#allocation5 + $0x1], 0  ;;  %s784_s20 = smov 0   ;;  %s786_s21 = smov 0  }
   0x7   :  { %s788_s22 = smov 0   ;;  %s790_s23 = smov 0  }
   0x8 LB: > { %s805_s2 = sadd.s32 4294967295, %s744_s23   ;;  %s558_s24 = sadd.s32 4294967294, %s744_s23   ;;  %s744_s23 = sphi %s790_s23, %s990_s23   ;;  %s740_s22 = sphi %s788_s22, %s989_s22   ;;  %s736_s21 = sphi %s786_s21, %s988_s21   ;;  %s732_s20 = sphi %s784_s20, %s987_s20  }
   0x9   : > { %s809_s25 = sadd.s32 1, %s744_s23   ;;  %s30_s26 = sadd.s32 1, %s740_s22 }
   0xa   : > { %s27_s27 = ssub.s32 %s744_s23, %s809_s25  ;;  %p37_p0 = scmp.ne.s32.totalorder %s740_s22, %s736_s21 }
   0xb   : > { %p28_p1 = scmp.eq.s32.totalorder %s27_s27, 0  ;;  %p38_p2 = scmp.eq.s32.totalorder %s744_s23, 0 }
   0xc   : > { %p43_p3 = scmp.ne.s32.totalorder %s736_s21, %s732_s20  ;;  %p44_p4 = scmp.eq.s32.totalorder %s805_s2, 0 }
   0xd   : > { %s821_s28 = scalar_select %p28_p1, %s740_s22, %s30_s26  }
   0xe   : > { %p823_p5 = por %p38_p2, %p37_p0  ;;  %p827_p6 = por %p44_p4, %p43_p3 }
   0xf   : > { %p151_p7 = scmp.eq.s32.totalorder %s805_s2, 1  ;;  %p157_p8 = scmp.eq.s32.totalorder %s558_s24, 1 }
  0x10   : > { %p606_p10 = scmp.lt.s32.totalorder %s744_s23, 2  ;;  %s189_s8 = sand.u32 1, %s740_s22  }
  0x11   : > { %p834_p11 = por %p151_p7, %p37_p0  ;;  %p838_p12 = por %p157_p8, %p43_p3 }
  0x12   : > { %s578_s9 = sshll.u32 %s744_s23, 7  ;;  %s561_s10 = sshll.u32 %s189_s8, 3 }
  0x13   : > { %s979_s6 = scalar_select %p834_p11, 1, 0 }
  0x14   : > { %s980_s7 = scalar_select %p838_p12, 1, 0 }
  0x15   : > { %s847_s13 = scalar_lea.hbm %s970_s0, %s578_s9  ;;  %s193_s14 = scalar_lea.vmem [#allocation3], %s561_s10 }
  0x16   : > { %s201_s15 = sshll.u32 %s193_s14, 4  ;;  %p851_p13 = pnand %p606_p10, %p823_p5  ;;  %s855_s15 = int_to_ptr.vmem [resolvable:$true] %s201_s15 }
  0x17   : > { %s190_s17 = scalar_lea.sflag [#allocation4], %s189_s8  ;;  %s648_s18 = scalar_lea.hbm %s847_s13, 128 }
  0x18   : > { %p649_p2 = scmp.ne.s32.totalorder %s847_s13, %s648_s18  ;;  %p650_p3 = pneg %p851_p13 }
  0x19   : > { %s653_s26 = scalar_lea.hbm %s970_s0, 256  ;;  %p654_p5 = scmp.lt.u32.totalorder %s847_s13, %s970_s0 }
  0x1a   : > { %p651_p4 = pnand %p650_p3, %p649_p2  ;;  %p655_p8 = scmp.lt.u32.totalorder %s653_s26, %s648_s18 }
  0x1b   : > { %p657_p9 = scmp.lt.u32.totalorder %s648_s18, %s847_s13 }
  0x1c   : > { %p652_p7 = pneg %p651_p4  ;;  %p656_p10 = por %p655_p8, %p654_p5 }
  0x1e   : > { %p658_p0 = por %p657_p9, %p656_p10 }
  0x20   : > { %p659_p1 = pnand %p658_p0, %p652_p7 }
  0x22   : > { %662 = shalt.err (!%p659_p1)
}
  0x23   : > { %s663_s8 = scalar_lea.vmem %s855_s15, 128  ;;  %s746_s9 = smov [#allocation3]  }
  0x24   : > { %p664_p2 = scmp.ne.s32.totalorder %s855_s15, %s663_s8  ;;  %s668_s10 = sshll.u32 %s746_s9, 4  ;;  %s669_s10 = int_to_ptr.vmem [resolvable:$false] %s668_s10 }
  0x25   : > { %s670_s11 = scalar_lea.vmem %s669_s10, 256  ;;  %p671_p11 = scmp.lt.s32.totalorder %s855_s15, %s669_s10 }
  0x26   : > { %p666_p4 = pnand %p664_p2, %p650_p3  ;;  %p672_p5 = scmp.lt.s32.totalorder %s670_s11, %s663_s8 }
  0x28   : > { %p667_p12 = pneg %p666_p4  ;;  %p673_p8 = por %p672_p5, %p671_p11 }
  0x2a   : > { %p674_p9 = pnand %p673_p8, %p667_p12 }
  0x2c   : > { %677 = shalt.err (!%p674_p9)
}
  0x2d   : > { %601 = dma.hbm_to_vmem [thread:$0]  (!%p851_p13), %s847_s13, 128, %s855_s15, %s190_s17  }
  0x2e   : > { %p982_p0 = scmp.lt.s32.totalorder %s744_s23, 3  ;;  %p983_p1 = scmp.ge.s32.totalorder %s744_s23, 1 }
  0x30   : > { %p207_p3 = pnand %p983_p1, %p982_p0 }
  0x31   : > { %s889_s12 = sand.u32 (!%p207_p3), 1, %s736_s21  }
  0x32   : > { %210 = sbr.rel (%p207_p3) target bundleno = 817 (0x331), region = 40  ;;  %s565_s14 = sshll.u32 (!%p207_p3), %s889_s12, 3 }
  0x33   : > { %s213_s18 = scalar_lea.sflag (!%p207_p3), [#allocation4], %s889_s12  ;;  %s216_s16 = scalar_lea.vmem (!%p207_p3), [#allocation3], %s565_s14 }
  0x39   : > { %723 = dma.done.wait (%p827_p6), %s213_s18, 128  }
  0x3a   : > { %725 = vsyncadd (%p827_p6), %s213_s18, 4294967168  ;;  %vm247_vm0 = vcmask 1043456   ;;  %v899_v1 = vld [vmem:[%s216_s16] sm:$0xff]  ;;  %v747_v10 = vmov 0.0   ;;  %vm748_vm1 = vmmov 0   ;;  %v260_v11 = vlaneseq  ;;  %s579_s26 = sshll.u32 %s805_s2, 7 }
  0x3b   : > { %v245_v2 = vcombine.high %v899_v1, %v899_v1  ;;  %v253_v3 = vsel %vm247_vm0, %v899_v1, 0.0  ;;  %v248_v5 = vsel %vm247_vm0, %v899_v1, -inf  ;;  %v275_v9 = vld [vmem:[%s971_s1] sm:$0xf]  ;;  %584 = vmatprep.subr.mxu0 %v747_v10  ;;  %586 = vmatprep.mubr.msk.f32.mxu0 %vm748_vm1, %v747_v10  ;;  %vm273_vm2 = vcmask 1040384   ;;  %s242_s27 = scalar_lea.vmem [#allocation6], %s565_s14  ;;  %s926_s10 = scalar_lea.hbm %s975_s5, %s579_s26 }
  0x3c   : > { %585 = vmatpush3.msk.msra.mxu0 %vm247_vm0, %v275_v9  ;;  %589 = vmatprep.subr.mxu1 %v747_v10  ;;  %v261_v12 = vand.u32 127, %v260_v11  ;;  %v263_v13 = vshrl.u32 %v260_v11, 7  ;;  %vm283_vm3 = vcmask 31744   ;;  %v369_v21 = vld [vmem:[%s973_s3] sm:$0x1]  ;;  %vm361_vm4 = vcmask 1024  }
  0x3d   : > { %v254_v4 = vsel %vm247_vm0, %v245_v2, 0.0  ;;  %v249_v6 = vsel %vm247_vm0, %v245_v2, -inf  ;;  %591 = vmatprep.mubr.msk.f32.mxu1 %vm748_vm1, %v747_v10  ;;  %590 = vmatpush3.msk.msra.mxu1 %vm273_vm2, %v369_v21  ;;  %v567_v22 = vld [vmem:[#allocation2] ss:$0 sm:$0xff]  ;;  %vm372_vm5 = vcmask 7168   ;;  %s488_s29 = sshll.u32 %s242_s27, 4  ;;  %s928_s29 = int_to_ptr.vmem [resolvable:$true] %s488_s29 }
  0x3e   : > { %v255_v7 = vadd.f32 %v254_v4, %v253_v3  ;;  %v250_v8 = vmax.f32 %v248_v5, %v249_v6  ;;  %v264_v15 = vsub.s32 %v261_v12, %v263_v13  ;;  %v370_v34 = vld [vmem:[%s974_s4] sm:$0x1]  ;;  %v457_v42 = vsub.s32 0, %v263_v13  ;;  %s474_s11 = scalar_lea.sflag [#allocation5], %s889_s12  ;;  %s678_s18 = scalar_lea.vmem %s928_s29, 128 }
  0x3f   : > { %v371_v35 = vmul.f32 2.0, %v370_v34  ;;  %v749_v45 = vmov 839922192   ;;  %p679_p6 = scmp.ne.s32.totalorder %s928_s29, %s678_s18  ;;  %p984_p11 = scmp.ne.s32.totalorder %s979_s6, 0 }
  0x40   : > { %256 = vadd.xlane.f32.xlu0 %v255_v7  ;;  %v464_v46 = vunpack.c.l.s4 %v749_v45  ;;  %s750_s2 = smov [#allocation6]  }
  0x41   : > { %p680_p12 = pnand %p679_p6, %p984_p11  ;;  %s682_s14 = sshll.u32 %s750_s2, 4  ;;  %s683_s14 = int_to_ptr.vmem [resolvable:$false] %s682_s14 }
  0x42   : > { %v465_v47 = vunpack.c.0.s8 %v464_v46  ;;  %s684_s16 = scalar_lea.vmem %s683_s14, 256  ;;  %p685_p7 = scmp.lt.s32.totalorder %s928_s29, %s683_s14 }
  0x43   : > { %p681_p13 = pneg %p680_p12  ;;  %p686_p10 = scmp.lt.s32.totalorder %s684_s16, %s678_s18 }
  0x44   : > { %251 = vmax.xlane.f32.xlu0 %v250_v8  ;;  %v468_v48 = vsub.s32 %v465_v47, %v263_v13 }
  0x45   : > { %p687_p2 = por %p686_p10, %p685_p7 }
  0x47   : > { %p688_p4 = pnand %p687_p2, %p681_p13 }
  0xcd   : > { %v257_v14 = vpop.xlane.xlu0 %256 }
  0xce   : > { %v258_v16 = vmul.f32 0.00390625, %v257_v14 }
  0xd0   : > { %v271_v18 = vrot.slane %v258_v16, %v264_v15 }
  0xd1   : > { %v252_v17 = vpop.xlane.xlu0 %251 }
  0xd2   : > { %v265_v19 = vrot.slane %v252_v17, %v264_v15 }
  0xd4   : > { %v274_v20 = vsel %vm273_vm2, %v265_v19, %v271_v18 }
  0xd5   : > { %587 = vmatmul.mubr.msk.f32.vlgmr.msra.gmra.mrb[0].mxu0 %vm283_vm3, %v274_v20 }
 0x1a8   : > { %v356_v23 = vpop.f32.mrb[0].mxu0 }
 0x1a9   : > { %v357_v24 = vadd.f32 %v567_v22, %v356_v23  ;;  %v588_v25 = vpop.f32.mrb[1].mxu0 }
 0x1ab   : > { %v360_v26 = vmax.f32 %v357_v24, 0.0 }
 0x1ad   : > { %v362_v27 = vsel %vm361_vm4, %v360_v26, 0.0 }
 0x1ae   : > { %v363_v28 = vrot.slane %v362_v27, 4 }
 0x1b0   : > { %v364_v29 = vadd.f32 %v363_v28, %v362_v27 }
 0x1b2   : > { %v365_v30 = vrot.slane %v364_v29, 2 }
 0x1b4   : > { %v366_v31 = vadd.f32 %v365_v30, %v364_v29 }
 0x1b6   : > { %v367_v32 = vrot.slane %v366_v31, 1 }
 0x1b8   : > { %v368_v33 = vadd.f32 %v367_v32, %v366_v31 }
 0x1ba   : > { %592 = vmatmul.mubr.msk.f32.vlgmr.msra.gmra.mrb[0].mxu1 %vm372_vm5, %v368_v33 }
 0x28d   : > { %v445_v36 = vpop.f32.mrb[0].mxu1 }
 0x28e   : > { %v446_v37 = vadd.f32 %v445_v36, %v371_v35  ;;  %v593_v38 = vpop.f32.mrb[1].mxu1 }
 0x290   : > { %v572_v39 = vmul.f32 -1.442695, %v446_v37 }
 0x292   : > { %644 = vpow2.f32 %v572_v39 }
 0x29c   : > { %v645_v40 = vpop.eup %644 }
 0x29d   : > { %v452_v41 = vadd.f32 1.0, %v645_v40 }
 0x29f   : > { %646 = vrcp.f32 %v452_v41 }
 0x2a9   : > { %v647_v43 = vpop.eup %646 }
 0x2aa   : > { %v458_v44 = vrot.slane %v647_v43, %v457_v42 }
 0x2ac   : > { %460 = vbcast.lane.b32.xlu1 %v458_v44, 256 }
 0x31e   : > { %v461_v49 = vpop.permute.xlu1 %460 }
 0x31f   : > { %v469_v50 = vrot.slane %v461_v49, %v468_v48 }
 0x321   : > { %v471_v51 = vmul.f32 %v469_v50, %v899_v1 }
 0x323   : > { %472 = vst [vmem:[%s242_s27] sm:$0xff] %v471_v51 }
 0x324   : > { %691 = shalt.err (!%p688_p4)
}
 0x325   : > { %s692_s12 = scalar_lea.hbm %s926_s10, 128  ;;  %s696_s15 = scalar_lea.hbm %s975_s5, 256 }
 0x326   : > { %p693_p5 = scmp.ne.s32.totalorder %s926_s10, %s692_s12  ;;  %p697_p0 = scmp.lt.u32.totalorder %s926_s10, %s975_s5 }
 0x327   : > { %p698_p1 = scmp.lt.u32.totalorder %s696_s15, %s692_s12  ;;  %p700_p6 = scmp.lt.u32.totalorder %s692_s12, %s926_s10 }
 0x328   : > { %p694_p8 = pnand %p693_p5, %p984_p11 }
 0x329   : > { %p699_p3 = por %p698_p1, %p697_p0 }
 0x32a   : > { %p695_p9 = pneg %p694_p8 }
 0x32b   : > { %p701_p12 = por %p700_p6, %p699_p3 }
 0x32d   : > { %p702_p13 = pnand %p701_p12, %p695_p9 }
 0x32f   : > { %705 = shalt.err (!%p702_p13)
}
 0x330   : > { %596 = dma.vmem_to_hbm [thread:$0]  (%p984_p11), %s928_s29, 128, %s926_s10, %s474_s11  }
 0x331 PF: > { %s500_s24 = sand.u32 1, %s732_s20   ;;  %p985_p7 = scmp.ne.s32.totalorder %s980_s7, 0 }
 0x332   : > { %p986_p10 = scmp.ge.s32.totalorder %s744_s23, 2  ;;  %s501_s26 = scalar_lea.sflag [#allocation5], %s500_s24 }
 0x334   : > { %p603_p2 = pnand %p986_p10, %p985_p7 }
 0x336   : > { %727 = dma.done.wait (!%p603_p2), %s501_s26, 128  }
 0x337   : > { %729 = vsyncadd (!%p603_p2), %s501_s26, 4294967168  ;;  %p20_p4 = scmp.ge.s32.totalorder %s809_s25, 4   ;;  %s987_s20 = smov %s736_s21 }
 0x338   : > { %s988_s21 = smov %s740_s22  ;;  %s989_s22 = smov %s821_s28 }
 0x339   : > { %s990_s23 = smov %s809_s25  ;;  %22 = sbr.rel (!%p20_p4) target bundleno = 8 (0x8), region = 85 }
 0x340   :  { %506 = vsyncpa [#allocation4], 1 }
 0x341   :  { %508 = vsyncpa [#allocation4 + $0x1], 1 }
 0x342   :  { %509 = vsyncpa [#allocation5], 1 }
 0x343   :  { %511 = vsyncpa [#allocation5 + $0x1], 1 }

</bundles_post_ra>
